<compile_context>
chip_gen: v7x
topology: tpu7x:2x2x1
jax: 0.10.0
libtpu: 0.0.40
codegen_flags: <defaults>
</compile_context>

<pallas_src>
import math

import jax
import jax.numpy as jnp
from jax import lax
from jax.experimental import pallas as pl
from jax.experimental.pallas import tpu as pltpu


def _mf_three_para_kernel(x_ref, ut_ref, vt_ref, bias_ref, c_ref, out_ref):
    # x_ref    : (TB, d, L)   tile of flattened samples
    # ut_ref   : (d, k_pad)   U^T, zero-padded along k (resident)
    # vt_ref   : (d, k_pad)   V^T, zero-padded along k (resident)
    # bias_ref : (1, k_pad)
    # c_ref    : (1, k_pad)
    # out_ref  : (TB, k_pad)
    tb = x_ref.shape[0]

    # Hoist resident operands out of the per-sample loop.
    ut = ut_ref[...]        # (d, k_pad)  -- k on lanes
    vt = vt_ref[...]        # (d, k_pad)
    bias_row = bias_ref[...]  # (1, k_pad)
    c_row = c_ref[...]        # (1, k_pad)

    for t in range(tb):     # static unroll; TB is a compile-time constant
        x_t = x_ref[t]      # (d, L)

        # Gram matrix G = x_t @ x_t.T (contraction over L = 256, good MXU
        # shape; dot_general contracting dims avoid an explicit transpose).
        g = lax.dot_general(
            x_t, x_t, (((1,), (1,)), ((), ())),
            preferred_element_type=jnp.float32)                    # (d, d)

        # sum_l z1*z2  ==  sum_{i,j} U[k,i] V[k,j] G[i,j]
        h = jnp.dot(g, vt, preferred_element_type=jnp.float32)     # (d, k_pad)
        pair = jnp.sum(ut * h, axis=0, keepdims=True)              # (1, k_pad)

        # xx == sum of all elements of G  (falls out of the Gram for free).
        xx = jnp.sum(g)                                            # scalar

        out_ref[pl.ds(t, 1), :] = pair + bias_row + c_row * xx


def mf_three_para(x, U, V, bias, C, *, tb=8):
    """Forward pass of mfThreePara. x: (B, d, H, W) float32 (NCHW).

    `tb` = samples per grid step (use a multiple of 8 when B >= tb).
    """
    k, d = U.shape
    B = x.shape[0]
    x3 = x.reshape(B, d, -1).astype(jnp.float32)   # (B, d, L)
    L = x3.shape[-1]

    # Pad k to a multiple of 128 so the output / epilogue are lane-dense.
    k_pad = ((k + 127) // 128) * 128               # 200 -> 256

    # Batch tile: TB samples per grid step; pad B up to a multiple of TB.
    TB = tb if B >= tb else B
    Bp = pl.cdiv(B, TB) * TB
    if Bp != B:
        # Zero-padded samples just produce `bias`; they are sliced off below.
        x3 = jnp.pad(x3, ((0, Bp - B), (0, 0), (0, 0)))

    # Transposed, zero-padded parameters: k lives on the lane axis everywhere.
    ut = jnp.zeros((d, k_pad), jnp.float32).at[:, :k].set(U.astype(jnp.float32).T)
    vt = jnp.zeros((d, k_pad), jnp.float32).at[:, :k].set(V.astype(jnp.float32).T)
    bias_p = jnp.zeros((1, k_pad), jnp.float32).at[0, :k].set(bias.astype(jnp.float32))
    c_p = jnp.zeros((1, k_pad), jnp.float32).at[0, :k].set(C.astype(jnp.float32))

    out = pl.pallas_call(
        _mf_three_para_kernel,
        out_shape=jax.ShapeDtypeStruct((Bp, k_pad), jnp.float32),
        grid_spec=pltpu.PrefetchScalarGridSpec(
            num_scalar_prefetch=0,
            grid=(Bp // TB,),
            in_specs=[
                pl.BlockSpec((TB, d, L), lambda b: (b, 0, 0)),   # x tile
                pl.BlockSpec((d, k_pad), lambda b: (0, 0)),      # U^T (resident)
                pl.BlockSpec((d, k_pad), lambda b: (0, 0)),      # V^T (resident)
                pl.BlockSpec((1, k_pad), lambda b: (0, 0)),      # bias
                pl.BlockSpec((1, k_pad), lambda b: (0, 0)),      # C
            ],
            out_specs=pl.BlockSpec((TB, k_pad), lambda b: (b, 0)),
        ),
        compiler_params=pltpu.CompilerParams(
            dimension_semantics=("parallel",),
        ),
    )(x3, ut, vt, bias_p, c_p)

    return out[:B, :k]


def mf_three_para_ref(x, U, V, bias, C):
    """Plain-JAX reference of the PyTorch forward (z1/z2 formulation)."""
    k, d = U.shape
    B = x.shape[0]
    x3 = x.reshape(B, d, -1)
    z1 = jnp.einsum("kd,bdl->bkl", U, x3, precision=lax.Precision.HIGHEST)
    z2 = jnp.einsum("kd,bdl->bkl", V, x3, precision=lax.Precision.HIGHEST)
    xx = jnp.sum(jnp.sum(x3, axis=1) ** 2, axis=1)          # (B,)
    cxx = C[None, :] * xx[:, None]                          # (B, k)
    return jnp.sum(z1 * z2, axis=2) + bias[None, :] + cxx   # (B, k)


if __name__ == "__main__":
    # Module parameters: k must be 200 (hard-coded in the PyTorch forward).
    k = 200
    d = 32
    B, H, W = 2, 16, 16   # x: (B, d, H, W), flattened to L = 256

    key = jax.random.PRNGKey(0)
    kx, ku, kv, kb, kc = jax.random.split(key, 5)

    # Deterministic parameter init (shapes from __init__).
    # xavier_uniform bound for (k, d) weights:
    bound = math.sqrt(6.0 / (k + d))
    U = jax.random.uniform(ku, (k, d), jnp.float32, -bound, bound)
    V = jax.random.uniform(kv, (k, d), jnp.float32, -bound, bound)
    # reset_parameters() sets bias and C to 0; we use small nonzero values
    # so the bias / C*xx terms are actually exercised by the kernel.
    bias = 0.01 * jax.random.normal(kb, (k,), jnp.float32)
    C = 0.01 * jax.random.normal(kc, (k,), jnp.float32)

    x = jax.random.normal(kx, (B, d, H, W), jnp.float32)

    out = mf_three_para(x, U, V, bias, C)
    out = jax.block_until_ready(out)

    ref = mf_three_para_ref(x, U, V, bias, C)
    assert out.shape == (B, k), out.shape
    assert jnp.allclose(out, ref, rtol=5e-3, atol=2e-2), (
        float(jnp.max(jnp.abs(out - ref)))
    )

    print("KERNEL_OK")
</pallas_src>

<mosaic_0001>
module attributes {stable_mosaic.version = 11 : i64} {
  func.func @_mf_three_para_kernel(%arg0: i32, %arg1: memref<2x32x256xf32, #tpu.memory_space<vmem>>, %arg2: memref<32x256xf32, #tpu.memory_space<vmem>>, %arg3: memref<32x256xf32, #tpu.memory_space<vmem>>, %arg4: memref<1x256xf32, #tpu.memory_space<vmem>>, %arg5: memref<1x256xf32, #tpu.memory_space<vmem>>, %arg6: memref<2x256xf32, #tpu.memory_space<vmem>>) attributes {dimension_semantics = [#tpu.dimension_semantics<parallel>], iteration_bounds = array<i64: 1>, scalar_prefetch = 0 : i64, scratch_operands = 0 : i64, tpu.core_type = #tpu.core_type<tc>, window_params = [{transform_indices = @transform_0, window_bounds = array<i64: 2, 32, 256>}, {pipeline_mode = #tpu.pipeline_mode<synchronous>, transform_indices = @transform_1, window_bounds = array<i64: 32, 256>}, {pipeline_mode = #tpu.pipeline_mode<synchronous>, transform_indices = @transform_2, window_bounds = array<i64: 32, 256>}, {pipeline_mode = #tpu.pipeline_mode<synchronous>, transform_indices = @transform_3, window_bounds = array<i64: 1, 256>}, {pipeline_mode = #tpu.pipeline_mode<synchronous>, transform_indices = @transform_4, window_bounds = array<i64: 1, 256>}, {transform_indices = @transform_5, window_bounds = array<i64: 2, 256>}]} {
    %c0 = arith.constant 0 : index
    %c0_0 = arith.constant 0 : index
    %0 = vector.load %arg2[%c0, %c0_0] : memref<32x256xf32, #tpu.memory_space<vmem>>, vector<32x256xf32>
    %c0_1 = arith.constant 0 : index
    %c0_2 = arith.constant 0 : index
    %1 = vector.load %arg3[%c0_1, %c0_2] : memref<32x256xf32, #tpu.memory_space<vmem>>, vector<32x256xf32>
    %c0_3 = arith.constant 0 : index
    %c0_4 = arith.constant 0 : index
    %2 = vector.load %arg4[%c0_3, %c0_4] : memref<1x256xf32, #tpu.memory_space<vmem>>, vector<1x256xf32>
    %c0_5 = arith.constant 0 : index
    %c0_6 = arith.constant 0 : index
    %3 = vector.load %arg5[%c0_5, %c0_6] : memref<1x256xf32, #tpu.memory_space<vmem>>, vector<1x256xf32>
    %c0_7 = arith.constant 0 : index
    %c0_8 = arith.constant 0 : index
    %c0_9 = arith.constant 0 : index
    %4 = vector.load %arg1[%c0_7, %c0_8, %c0_9] : memref<2x32x256xf32, #tpu.memory_space<vmem>>, vector<1x32x256xf32>
    %5 = vector.shape_cast %4 : vector<1x32x256xf32> to vector<32x256xf32>
    %cst = arith.constant dense<0.000000e+00> : vector<32x32xf32>
    %6 = tpu.matmul %5, %5, %cst {dimension_numbers = #tpu.dot_dimension_numbers<[1], [1], [0], [0], [0, 0, 1, 0], [], []>} : vector<32x256xf32>, vector<32x256xf32>, vector<32x32xf32> -> vector<32x32xf32>
    %cst_10 = arith.constant dense<0.000000e+00> : vector<32x256xf32>
    %7 = tpu.matmul %6, %1, %cst_10 {dimension_numbers = #tpu.dot_dimension_numbers<[1], [0], [0], [1], [0, 0, 1, 1], [], []>} : vector<32x32xf32>, vector<32x256xf32>, vector<32x256xf32> -> vector<32x256xf32>
    %8 = arith.mulf %0, %7 : vector<32x256xf32>
    %cst_11 = arith.constant dense<0.000000e+00> : vector<256xf32>
    %9 = vector.multi_reduction <add>, %8, %cst_11 [0] : vector<32x256xf32> to vector<256xf32>
    %10 = vector.shape_cast %9 : vector<256xf32> to vector<1x256xf32>
    %11 = vector.shape_cast %6 : vector<32x32xf32> to vector<1x32x32xf32>
    %cst_12 = arith.constant dense<0.000000e+00> : vector<1xf32>
    %12 = vector.multi_reduction <add>, %11, %cst_12 [1, 2] : vector<1x32x32xf32> to vector<1xf32>
    %13 = vector.shape_cast %12 : vector<1xf32> to vector<1x1x1xf32>
    %14 = vector.extract %13[0, 0, 0] : f32 from vector<1x1x1xf32>
    %15 = arith.addf %10, %2 : vector<1x256xf32>
    %16 = vector.broadcast %14 : f32 to vector<1x256xf32>
    %17 = arith.mulf %3, %16 : vector<1x256xf32>
    %18 = arith.addf %15, %17 : vector<1x256xf32>
    %c0_13 = arith.constant 0 : index
    %c0_14 = arith.constant 0 : index
    %19 = vector.load %arg6[%c0_13, %c0_14] : memref<2x256xf32, #tpu.memory_space<vmem>>, vector<1x256xf32>
    tpu.vector_store %arg6[%c0_13, %c0_14], %18 {strides = array<i32>} : memref<2x256xf32, #tpu.memory_space<vmem>>, vector<1x256xf32>,
    %c1 = arith.constant 1 : index
    %c0_15 = arith.constant 0 : index
    %c0_16 = arith.constant 0 : index
    %20 = vector.load %arg1[%c1, %c0_15, %c0_16] : memref<2x32x256xf32, #tpu.memory_space<vmem>>, vector<1x32x256xf32>
    %21 = vector.shape_cast %20 : vector<1x32x256xf32> to vector<32x256xf32>
    %cst_17 = arith.constant dense<0.000000e+00> : vector<32x32xf32>
    %22 = tpu.matmul %21, %21, %cst_17 {dimension_numbers = #tpu.dot_dimension_numbers<[1], [1], [0], [0], [0, 0, 1, 0], [], []>} : vector<32x256xf32>, vector<32x256xf32>, vector<32x32xf32> -> vector<32x32xf32>
    %cst_18 = arith.constant dense<0.000000e+00> : vector<32x256xf32>
    %23 = tpu.matmul %22, %1, %cst_18 {dimension_numbers = #tpu.dot_dimension_numbers<[1], [0], [0], [1], [0, 0, 1, 1], [], []>} : vector<32x32xf32>, vector<32x256xf32>, vector<32x256xf32> -> vector<32x256xf32>
    %24 = arith.mulf %0, %23 : vector<32x256xf32>
    %cst_19 = arith.constant dense<0.000000e+00> : vector<256xf32>
    %25 = vector.multi_reduction <add>, %24, %cst_19 [0] : vector<32x256xf32> to vector<256xf32>
    %26 = vector.shape_cast %25 : vector<256xf32> to vector<1x256xf32>
    %27 = vector.shape_cast %22 : vector<32x32xf32> to vector<1x32x32xf32>
    %cst_20 = arith.constant dense<0.000000e+00> : vector<1xf32>
    %28 = vector.multi_reduction <add>, %27, %cst_20 [1, 2] : vector<1x32x32xf32> to vector<1xf32>
    %29 = vector.shape_cast %28 : vector<1xf32> to vector<1x1x1xf32>
    %30 = vector.extract %29[0, 0, 0] : f32 from vector<1x1x1xf32>
    %31 = arith.addf %26, %2 : vector<1x256xf32>
    %32 = vector.broadcast %30 : f32 to vector<1x256xf32>
    %33 = arith.mulf %3, %32 : vector<1x256xf32>
    %34 = arith.addf %31, %33 : vector<1x256xf32>
    %c1_21 = arith.constant 1 : index
    %c0_22 = arith.constant 0 : index
    %35 = vector.load %arg6[%c1_21, %c0_22] : memref<2x256xf32, #tpu.memory_space<vmem>>, vector<1x256xf32>
    tpu.vector_store %arg6[%c1_21, %c0_22], %34 {strides = array<i32>} : memref<2x256xf32, #tpu.memory_space<vmem>>, vector<1x256xf32>,
    return
  }
  func.func @transform_0(%arg0: i32) -> (i32, i32, i32) {
    %c0_i32 = arith.constant 0 : i32
    %c0_i32_0 = arith.constant 0 : i32
    %c0_i32_1 = arith.constant 0 : i32
    return %arg0, %c0_i32, %c0_i32_0 : i32, i32, i32
  }
  func.func @transform_1(%arg0: i32) -> (i32, i32) {
    %c0_i32 = arith.constant 0 : i32
    %c0_i32_0 = arith.constant 0 : i32
    %c0_i32_1 = arith.constant 0 : i32
    return %c0_i32, %c0_i32_0 : i32, i32
  }
  func.func @transform_2(%arg0: i32) -> (i32, i32) {
    %c0_i32 = arith.constant 0 : i32
    %c0_i32_0 = arith.constant 0 : i32
    %c0_i32_1 = arith.constant 0 : i32
    return %c0_i32, %c0_i32_0 : i32, i32
  }
  func.func @transform_3(%arg0: i32) -> (i32, i32) {
    %c0_i32 = arith.constant 0 : i32
    %c0_i32_0 = arith.constant 0 : i32
    %c0_i32_1 = arith.constant 0 : i32
    return %c0_i32, %c0_i32_0 : i32, i32
  }
  func.func @transform_4(%arg0: i32) -> (i32, i32) {
    %c0_i32 = arith.constant 0 : i32
    %c0_i32_0 = arith.constant 0 : i32
    %c0_i32_1 = arith.constant 0 : i32
    return %c0_i32, %c0_i32_0 : i32, i32
  }
  func.func @transform_5(%arg0: i32) -> (i32, i32) {
    %c0_i32 = arith.constant 0 : i32
    %c0_i32_0 = arith.constant 0 : i32
    return %arg0, %c0_i32 : i32, i32
  }
}

</mosaic_0001>

<bundles_post_ra>
// kernel: tpu_custom_call.1
= control target key start
LH: loop header
LB: loop body
LE: loop exit
PB: predicated region body
PF: predicated region fallthrough
CT: control target
= control target key end

     0   :  { %10 = vsyncpa [#allocation3], 0  ;;  %s1028_s0 = inlined_call_operand.hbm [shape: f32[2,32,256], index: 0, kind: input, shape index: {}]   ;;  %s1029_s1 = inlined_call_operand.hbm [shape: f32[32,256], index: 1, kind: input, shape index: {}]   ;;  %s1030_s2 = inlined_call_operand.hbm [shape: f32[32,256], index: 2, kind: input, shape index: {}]   ;;  %s1031_s3 = inlined_call_operand.vmem [shape: f32[1,256], index: 3, kind: input, shape index: {}]   ;;  %s1032_s4 = inlined_call_operand.vmem [shape: f32[1,256], index: 4, kind: input, shape index: {}]   ;;  %s1033_s5 = inlined_call_operand.hbm [shape: f32[2,256], index: 5, kind: output, shape index: {}]  }
   0x1   :  { %11 = vsyncpa [#allocation6], 0 }
   0x2   :  { %12 = vsyncpa [#allocation4], 0  ;;  %s808_s18 = smov [#allocation5]   ;;  %s809_s20 = smov [#allocation2]  }
   0x3   :  { %s30_s19 = sshll.u32 %s808_s18, 4  ;;  %s18_s21 = sshll.u32 %s809_s20, 4  ;;  %s31_s19 = int_to_ptr.vmem [resolvable:$true] %s30_s19  ;;  %s846_s21 = int_to_ptr.vmem [resolvable:$true] %s18_s21 }
   0x4   :  { %s714_s24 = scalar_lea.hbm %s1029_s1, 1024 }
   0x5   :  { %p715_p0 = scmp.ne.s32.totalorder %s1029_s1, %s714_s24  ;;  %p718_p1 = scmp.lt.u32.totalorder %s714_s24, %s1029_s1 }
   0x7   :  { %p720_p2 = pnand %p718_p1, %p715_p0 }
   0x9   :  { %723 = shalt.err (!%p720_p2)
}
   0xa   :  { %s724_s29 = scalar_lea.vmem %s31_s19, 1024  ;;  %p729_p4 = scmp.lt.s32.totalorder %s31_s19, %s31_s19 }
   0xb   :  { %p725_p3 = scmp.ne.s32.totalorder %s31_s19, %s724_s29  ;;  %p730_p5 = scmp.lt.s32.totalorder %s724_s29, %s724_s29 }
   0xd   :  { %p731_p6 = por %p730_p5, %p729_p4 }
   0xf   :  { %p732_p7 = pnand %p731_p6, %p725_p3 }
  0x11   :  { %735 = shalt.err (!%p732_p7)
}
  0x12   :  { %s810_s30 = smov 256   ;;  %s811_s6 = smov 16  }
  0x13   :  { %36 = dma.hbm_to_vmem [thread:$0]  %s1029_s1, 1024, %s31_s19, [#allocation6], %s810_s30, %s810_s30, %s811_s6  }
  0x14   :  { %s736_s11 = scalar_lea.hbm %s1028_s0, 2048 }
  0x15   :  { %p737_p8 = scmp.ne.s32.totalorder %s1028_s0, %s736_s11  ;;  %p740_p9 = scmp.lt.u32.totalorder %s736_s11, %s1028_s0 }
  0x17   :  { %p742_p10 = pnand %p740_p9, %p737_p8 }
  0x19   :  { %745 = shalt.err (!%p742_p10)
}
  0x1a   :  { %s746_s16 = scalar_lea.vmem %s846_s21, 2048  ;;  %p751_p12 = scmp.lt.s32.totalorder %s846_s21, %s846_s21 }
  0x1b   :  { %p747_p11 = scmp.ne.s32.totalorder %s846_s21, %s746_s16  ;;  %p752_p13 = scmp.lt.s32.totalorder %s746_s16, %s746_s16 }
  0x1d   :  { %p753_p0 = por %p752_p13, %p751_p12 }
  0x1f   :  { %p754_p1 = pnand %p753_p0, %p747_p11 }
  0x21   :  { %757 = shalt.err (!%p754_p1)
}
  0x22   :  { %24 = dma.hbm_to_vmem [thread:$0]  %s1028_s0, 2048, %s846_s21, [#allocation3], %s810_s30, %s810_s30, %s811_s6  }
  0x23   :  { %s812_s18 = smov [#allocation7]   ;;  %s758_s23 = scalar_lea.hbm %s1030_s2, 1024 }
  0x24   :  { %s42_s19 = sshll.u32 %s812_s18, 4  ;;  %p759_p2 = scmp.ne.s32.totalorder %s1030_s2, %s758_s23  ;;  %s43_s19 = int_to_ptr.vmem [resolvable:$true] %s42_s19 }
  0x25   :  { %p762_p3 = scmp.lt.u32.totalorder %s758_s23, %s1030_s2 }
  0x27   :  { %p764_p4 = pnand %p762_p3, %p759_p2 }
  0x29   :  { %767 = shalt.err (!%p764_p4)
}
  0x2a   :  { %s768_s28 = scalar_lea.vmem %s43_s19, 1024  ;;  %p773_p6 = scmp.lt.s32.totalorder %s43_s19, %s43_s19 }
  0x2b   :  { %p769_p5 = scmp.ne.s32.totalorder %s43_s19, %s768_s28  ;;  %p774_p7 = scmp.lt.s32.totalorder %s768_s28, %s768_s28 }
  0x2d   :  { %p775_p8 = por %p774_p7, %p773_p6 }
  0x2f   :  { %p776_p9 = pnand %p775_p8, %p769_p5 }
  0x31   :  { %779 = shalt.err (!%p776_p9)
}
  0x32   :  { %48 = dma.hbm_to_vmem [thread:$0]  %s1030_s2, 1024, %s43_s19, [#allocation6], %s810_s30, %s810_s30, %s811_s6  }
  0x33   :  { %802 = dma.done.wait [#allocation3], 2048  }
  0x34   :  { %803 = vsyncadd [#allocation3], 4294965248 }
  0x35   :  { %804 = dma.done.wait [#allocation6], 2048  }
  0x36   :  { %805 = vsyncadd [#allocation6], 4294965248  ;;  %v81_v0 = vld [vmem:[#allocation2 + $0x8] sm:$0xff]  ;;  %v83_v1 = vld [vmem:[#allocation2 + $0x18] sm:$0xff]  ;;  %v813_v27 = vmov 0.0   ;;  %vm173_vm0 = vcmask 261120  }
  0x37   :  { %v80_v2 = vld [vmem:[#allocation2] sm:$0xff]  ;;  %v666_v3 = vpack.c.bf16 %v83_v1, %v81_v0  ;;  %v82_v4 = vld [vmem:[#allocation2 + $0x10] sm:$0xff]  ;;  %v85_v5 = vld [vmem:[#allocation2 + $0x28] sm:$0xff]  ;;  %152 = vmatprep.mubr.f32.mxu0 %v81_v0  ;;  %250 = vmatprep.mubr.f32.mxu1 %v813_v27 }
  0x38   :  { %v87_v6 = vld [vmem:[#allocation2 + $0x38] sm:$0xff]  ;;  %v668_v7 = vpack.c.bf16 %v82_v4, %v80_v2  ;;  %v71_v9 = vld [vmem:[#allocation7 + $0x8] sm:$0xff]  ;;  %v70_v11 = vld [vmem:[#allocation7] sm:$0xff] }
  0x39   :  { %v670_v8 = vpack.c.bf16 %v87_v6, %v85_v5  ;;  %667 = vmatprep.subr.bf16.mxu0 %v666_v3  ;;  %v73_v10 = vld [vmem:[#allocation7 + $0x18] sm:$0xff]  ;;  %v72_v12 = vld [vmem:[#allocation7 + $0x10] sm:$0xff]  ;;  %v75_v15 = vld [vmem:[#allocation7 + $0x28] sm:$0xff] }
  0x3a   :  { %669 = vmatpush1.bf16.xpose.msra.mxu0 %v668_v7  ;;  %v898_v13 = vpack.c.bf16 %v73_v10, %v71_v9  ;;  %v900_v14 = vpack.c.bf16 %v72_v12, %v70_v11  ;;  %v77_v16 = vld [vmem:[#allocation7 + $0x38] sm:$0xff]  ;;  %v74_v17 = vld [vmem:[#allocation7 + $0x20] sm:$0xff]  ;;  %v86_v19 = vld [vmem:[#allocation2 + $0x30] sm:$0xff] }
  0x3b   :  { %671 = vmatprep.subr.bf16.mxu0 %v670_v8  ;;  %v84_v18 = vld [vmem:[#allocation2 + $0x20] sm:$0xff]  ;;  %v902_v20 = vpack.c.bf16 %v77_v16, %v75_v15  ;;  %v76_v21 = vld [vmem:[#allocation7 + $0x30] sm:$0xff]  ;;  %v370_v24 = vld [vmem:[#allocation2 + $0x48] sm:$0xff] }
  0x3c   :  { %675 = vmatprep.subr.bf16.mxu1 %v898_v13  ;;  %v906_v22 = vpack.c.bf16 %v76_v21, %v74_v17  ;;  %v672_v23 = vpack.c.bf16 %v86_v19, %v84_v18  ;;  %v372_v25 = vld [vmem:[#allocation2 + $0x58] sm:$0xff]  ;;  %v369_v28 = vld [vmem:[#allocation2 + $0x40] sm:$0xff]  ;;  %v371_v29 = vld [vmem:[#allocation2 + $0x50] sm:$0xff] }
  0x3d   :  { %677 = vmatpush1.bf16.msra.mxu1 %v900_v14  ;;  %v682_v26 = vpack.c.bf16 %v372_v25, %v370_v24  ;;  %v374_v30 = vld [vmem:[#allocation2 + $0x68] sm:$0xff]  ;;  %v376_v31 = vld [vmem:[#allocation2 + $0x78] sm:$0xff]  ;;  %v684_v32 = vpack.c.bf16 %v371_v29, %v369_v28  ;;  %v373_v36 = vld [vmem:[#allocation2 + $0x60] sm:$0xff] }
  0x3e   :  { %679 = vmatprep.subr.bf16.mxu1 %v902_v20  ;;  %v686_v33 = vpack.c.bf16 %v376_v31, %v374_v30  ;;  %v375_v37 = vld [vmem:[#allocation2 + $0x70] sm:$0xff]  ;;  %v932_v61 = vld [vmem:[#allocation5] sm:$0xff]  ;;  %v936_v63 = vld [vmem:[#allocation5 + $0x8] sm:$0xff] }
  0x3f   :  { %v688_v43 = vpack.c.bf16 %v375_v37, %v373_v36  ;;  %v934_v62 = vld [vmem:[#allocation5 + $0x10] sm:$0xff]  ;;  %v938_v0 = vld [vmem:[#allocation5 + $0x18] sm:$0xff]  ;;  %v944_v7 = vld [vmem:[#allocation5 + $0x20] sm:$0xff] }
  0x40   :  { %v946_v9 = vld [vmem:[#allocation5 + $0x28] sm:$0xff]  ;;  %v950_v15 = vld [vmem:[#allocation5 + $0x30] sm:$0xff]  ;;  %v952_v17 = vld [vmem:[#allocation5 + $0x38] sm:$0xff] }
  0x41   :  { %681 = vmatpush1.bf16.msra.mxu1 %v906_v22 }
  0x42   :  { %673 = vmatpush1.bf16.xpose.msra.mxu0 %v672_v23  ;;  %683 = vmatprep.subr.bf16.mxu1 %v682_v26  ;;  %v318_v23 = vlaneseq }
  0x43   :  { %691 = vmatprep.subr.bf16.mxu0 %v898_v13 }
  0x44   :  { %vm992_vm1 = vcmp.lt.s32.totalorder %v318_v23, 256 }
  0x49   :  { %153 = vmatmul.mubr.f32.vlgmr.msra.gmra.mrb[0].mxu0 %v80_v2 }
  0x4a   :  { %157 = vmatprep.mubr.f32.mxu0 %v83_v1  ;;  %693 = vmatpush1.bf16.msra.mxu0 %v900_v14 }
  0x4b   :  { %695 = vmatprep.subr.bf16.mxu0 %v902_v20 }
  0x4d   :  { %158 = vmatmul.mubr.f32.gmra.mrb[2].mxu0 %v82_v4 }
  0x4e   :  { %162 = vmatprep.mubr.f32.mxu0 %v85_v5  ;;  %697 = vmatpush1.bf16.msra.mxu0 %v906_v22 }
  0x51   :  { %163 = vmatmul.mubr.f32.gmra.mrb[4].mxu0 %v84_v18 }
  0x52   :  { %167 = vmatprep.mubr.f32.mxu0 %v87_v6 }
  0x55   :  { %168 = vmatmul.mubr.f32.gmra.mrb[6].mxu0 %v86_v19 }
  0x56   :  { %538 = vmatprep.mubr.f32.mxu0 %v813_v27 }
 0x11c   :  { %v154_v34 = vpop.f32.mrb[0].mxu0 }
 0x11d   :  { %v156_v35 = vpop.f32.mrb[1].mxu0  ;;  %658 = vmatmul.mubr.msk.f32.vlgmr.msra.gmra.mrb[0].mxu1 %vm173_vm0, %v154_v34  ;;  %v301_v39 = vsel %vm173_vm0, %v154_v34, 0.0 }
 0x11e   :  { %685 = vmatpush1.bf16.xpose.msra.mxu1 %v684_v32  ;;  %256 = vmatprep.mubr.f32.mxu1 %v813_v27 }
 0x11f   :  { %687 = vmatprep.subr.bf16.mxu1 %v686_v33 }
 0x120   :  { %v159_v38 = vpop.f32.mrb[2].mxu0 }
 0x121   :  { %v302_v40 = vsel %vm173_vm0, %v159_v38, 0.0  ;;  %v161_v41 = vpop.f32.mrb[3].mxu0  ;;  %659 = vmatmul.mubr.msk.f32.gmra.mrb[2].mxu1 %vm173_vm0, %v159_v38 }
 0x122   :  { %v303_v42 = vadd.f32 %v302_v40, %v301_v39  ;;  %262 = vmatprep.mubr.f32.mxu1 %v813_v27  ;;  %v964_v39 = vld [vmem:[%s1032_s4] sm:$0x3]  ;;  %s815_s4 = smov [#allocation8]  }
 0x123   :  { %v78_v41 = vld [vmem:[%s1031_s3] sm:$0x3]  ;;  %s648_s8 = sshll.u32 %s815_s4, 4  ;;  %s649_s8 = int_to_ptr.vmem [resolvable:$true] %s648_s8 }
 0x124   :  { %v164_v44 = vpop.f32.mrb[4].mxu0  ;;  %s780_s9 = scalar_lea.vmem %s649_s8, 64  ;;  %p785_p11 = scmp.lt.s32.totalorder %s649_s8, %s649_s8 }
 0x125   :  { %v304_v45 = vsel %vm173_vm0, %v164_v44, 0.0  ;;  %v166_v46 = vpop.f32.mrb[5].mxu0  ;;  %660 = vmatmul.mubr.msk.f32.gmra.mrb[4].mxu1 %vm173_vm0, %v164_v44  ;;  %p781_p10 = scmp.ne.s32.totalorder %s649_s8, %s780_s9  ;;  %p786_p12 = scmp.lt.s32.totalorder %s780_s9, %s780_s9 }
 0x126   :  { %689 = vmatpush1.bf16.xpose.msra.mxu1 %v688_v43  ;;  %268 = vmatprep.mubr.f32.mxu1 %v813_v27  ;;  %v305_v47 = vadd.f32 %v304_v45, %v303_v42 }
 0x127   :  { %698 = vmatprep.subr.bf16.mxu1 %v898_v13  ;;  %p787_p13 = por %p786_p12, %p785_p11 }
 0x128   :  { %v169_v48 = vpop.f32.mrb[6].mxu0 }
 0x129   :  { %v171_v49 = vpop.f32.mrb[7].mxu0  ;;  %661 = vmatmul.mubr.msk.f32.gmra.mrb[6].mxu1 %vm173_vm0, %v169_v48  ;;  %v306_v50 = vsel %vm173_vm0, %v169_v48, 0.0  ;;  %p788_p0 = pnand %p787_p13, %p781_p10 }
 0x12a   :  { %v307_v51 = vadd.f32 %v306_v50, %v305_v47  ;;  %441 = vmatprep.mubr.f32.mxu1 %v370_v24  ;;  %v814_v49 = vmov 1966171168  }
 0x12b   :  { %v349_v50 = vunpack.c.l.s4 %v814_v49 }
 0x12c   :  { %308 = vadd.xlane.f32.xlu0 %v307_v51 }
 0x12d   :  { %442 = vmatmul.mubr.f32.vlgmr.msra.gmra.mrb[8].mxu1 %v369_v28 }
 0x12e   :  { %446 = vmatprep.mubr.f32.mxu1 %v372_v25  ;;  %700 = vmatpush1.bf16.msra.mxu1 %v900_v14 }
 0x12f   :  { %699 = vmatprep.subr.bf16.mxu1 %v902_v20 }
 0x131   :  { %447 = vmatmul.mubr.f32.gmra.mrb[10].mxu1 %v371_v29 }
 0x132   :  { %451 = vmatprep.mubr.f32.mxu1 %v374_v30  ;;  %701 = vmatpush1.bf16.msra.mxu1 %v906_v22 }
 0x135   :  { %452 = vmatmul.mubr.f32.gmra.mrb[12].mxu1 %v373_v36 }
 0x136   :  { %456 = vmatprep.mubr.f32.mxu1 %v376_v31  ;;  %v319_v31 = vshrl.u32 %v318_v23, 7 }
 0x138   :  { %v970_v44 = vsub.s32 0, %v319_v31  ;;  %v972_v46 = vsub.s32 1, %v319_v31 }
 0x139   :  { %457 = vmatmul.mubr.f32.gmra.mrb[14].mxu1 %v375_v37 }
 0x13a   :  { %556 = vmatprep.mubr.f32.mxu1 %v813_v27 }
 0x1b9   :  { %v309_v52 = vpop.xlane.xlu0 %308 }
 0x1ba   :  { %v310_v53 = vrot.slane %v309_v52, 4 }
 0x1bc   :  { %v311_v54 = vadd.f32 %v310_v53, %v309_v52  ;;  %v976_v53 = vrot.slane %v78_v41, %v970_v44 }
 0x1be   :  { %v312_v55 = vrot.slane %v311_v54, 2 }
 0x1c0   :  { %v313_v56 = vadd.f32 %v312_v55, %v311_v54 }
 0x1c2   :  { %v314_v57 = vrot.slane %v313_v56, 1 }
 0x1c4   :  { %v315_v58 = vadd.f32 %v314_v57, %v313_v56  ;;  %v981_v56 = vrot.slane %v78_v41, %v972_v46 }
 0x1c6   :  { %702 = vpush %v315_v58 }
 0x1f0   :  { %v252_v59 = vpop.f32.mrb[0].mxu1 }
 0x1f1   :  { %v254_v60 = vpop.f32.mrb[1].mxu1  ;;  %v275_v2 = vmul.f32 %v252_v59, %v932_v61 }
 0x1f2   :  { %v276_v5 = vmul.f32 %v254_v60, %v936_v63 }
 0x1f4   :  { %v258_v1 = vpop.f32.mrb[2].mxu1 }
 0x1f5   :  { %v277_v3 = vmul.f32 %v258_v1, %v934_v62  ;;  %v260_v4 = vpop.f32.mrb[3].mxu1  ;;  %v350_v1 = vunpack.c.0.s8 %v349_v50 }
 0x1f6   :  { %v278_v6 = vmul.f32 %v260_v4, %v938_v0 }
 0x1f7   :  { %v283_v8 = vadd.f32 %v277_v3, %v275_v2  ;;  %s703_s2 = spop %702 }
 0x1f8   :  { %v292_v10 = vadd.f32 %v278_v6, %v276_v5  ;;  %v264_v11 = vpop.f32.mrb[4].mxu1  ;;  %v330_v40 = vstv %s703_s2 }
 0x1f9   :  { %v279_v12 = vmul.f32 %v264_v11, %v944_v7  ;;  %v266_v13 = vpop.f32.mrb[5].mxu1  ;;  %v331_v51 = vmul.f32 %v330_v40, %v964_v39 }
 0x1fa   :  { %v280_v14 = vmul.f32 %v266_v13, %v946_v9  ;;  %v989_v13 = vsub.s32 %v350_v1, %v319_v31 }
 0x1fb   :  { %v284_v16 = vadd.f32 %v283_v8, %v279_v12  ;;  %v336_v2 = vrot.slane %v331_v51, %v970_v44  ;;  %v340_v6 = vrot.slane %v331_v51, %v972_v46 }
 0x1fc   :  { %v293_v18 = vadd.f32 %v292_v10, %v280_v14  ;;  %v270_v19 = vpop.f32.mrb[6].mxu1 }
 0x1fd   :  { %v281_v20 = vmul.f32 %v270_v19, %v950_v15  ;;  %v272_v21 = vpop.f32.mrb[7].mxu1 }
 0x1fe   :  { %v282_v22 = vmul.f32 %v272_v21, %v952_v17 }
 0x1ff   :  { %v285_v24 = vadd.f32 %v284_v16, %v281_v20 }
 0x200   :  { %v294_v25 = vadd.f32 %v293_v18, %v282_v22  ;;  %v443_v26 = vpop.f32.mrb[8].mxu1 }
 0x201   :  { %v286_v28 = vrot.slane %v285_v24, 4  ;;  %v445_v29 = vpop.f32.mrb[9].mxu1  ;;  %662 = vmatmul.mubr.msk.f32.vlgmr.msra.gmra.mrb[8].mxu0 %vm173_vm0, %v443_v26  ;;  %v589_v36 = vsel %vm173_vm0, %v443_v26, 0.0 }
 0x202   :  { %v295_v30 = vrot.slane %v294_v25, 4  ;;  %544 = vmatprep.mubr.f32.mxu0 %v813_v27 }
 0x203   :  { %v287_v32 = vadd.f32 %v286_v28, %v285_v24 }
 0x204   :  { %v296_v33 = vadd.f32 %v295_v30, %v294_v25  ;;  %v448_v34 = vpop.f32.mrb[10].mxu1 }
 0x205   :  { %v288_v35 = vrot.slane %v287_v32, 2  ;;  %v590_v37 = vsel %vm173_vm0, %v448_v34, 0.0  ;;  %v450_v38 = vpop.f32.mrb[11].mxu1  ;;  %663 = vmatmul.mubr.msk.f32.gmra.mrb[10].mxu0 %vm173_vm0, %v448_v34 }
 0x206   :  { %v297_v42 = vrot.slane %v296_v33, 2  ;;  %v591_v43 = vadd.f32 %v590_v37, %v589_v36  ;;  %550 = vmatprep.mubr.f32.mxu0 %v813_v27 }
 0x207   :  { %v289_v45 = vadd.f32 %v288_v35, %v287_v32 }
 0x208   :  { %v298_v47 = vadd.f32 %v297_v42, %v296_v33  ;;  %v453_v48 = vpop.f32.mrb[12].mxu1 }
 0x209   :  { %v290_v52 = vrot.slane %v289_v45, 1  ;;  %v592_v54 = vsel %vm173_vm0, %v453_v48, 0.0  ;;  %v455_v55 = vpop.f32.mrb[13].mxu1  ;;  %664 = vmatmul.mubr.msk.f32.gmra.mrb[12].mxu0 %vm173_vm0, %v453_v48 }
 0x20a   :  { %v299_v27 = vrot.slane %v298_v47, 1  ;;  %v593_v57 = vadd.f32 %v592_v54, %v591_v43 }
 0x20b   :  { %v291_v58 = vadd.f32 %v290_v52, %v289_v45 }
 0x20c   :  { %v300_v59 = vadd.f32 %v299_v27, %v298_v47  ;;  %v458_v60 = vpop.f32.mrb[14].mxu1 }
 0x20d   :  { %v328_v3 = vadd.f32 %v976_v53, %v291_v58  ;;  %v594_v4 = vsel %vm173_vm0, %v458_v60, 0.0  ;;  %v460_v5 = vpop.f32.mrb[15].mxu1  ;;  %665 = vmatmul.mubr.msk.f32.vlgmr.msra.gmra.mrb[16].mxu1 %vm173_vm0, %v458_v60 }
 0x20e   :  { %v329_v8 = vadd.f32 %v981_v56, %v300_v59  ;;  %v595_v10 = vadd.f32 %v594_v4, %v593_v57 }
 0x20f   :  { %v343_v11 = vadd.f32 %v336_v2, %v328_v3 }
 0x210   :  { %v344_v12 = vadd.f32 %v340_v6, %v329_v8  ;;  %596 = vadd.xlane.f32.xlu0 %v595_v10 }
 0x212   :  { %v347_v14 = vcombine.low %v343_v11, %v344_v12 }
 0x214   :  { %v354_v16 = vrot.slane %v347_v14, %v989_v13 }
 0x216   :  { %v361_v19 = vrot.slane %v354_v16, %v989_v13 }
 0x218   :  { %367 = vst.msk [vmem:[#allocation8] ss:$2 sm:$0x3] %vm992_vm1, %v361_v19 }
 0x29d   :  { %v597_v20 = vpop.xlane.xlu0 %596 }
 0x29e   :  { %v598_v21 = vrot.slane %v597_v20, 4 }
 0x2a0   :  { %v599_v22 = vadd.f32 %v598_v21, %v597_v20 }
 0x2a2   :  { %v600_v24 = vrot.slane %v599_v22, 2 }
 0x2a4   :  { %v601_v25 = vadd.f32 %v600_v24, %v599_v22 }
 0x2a6   :  { %v602_v26 = vrot.slane %v601_v25, 1 }
 0x2a8   :  { %v603_v28 = vadd.f32 %v602_v26, %v601_v25 }
 0x2aa   :  { %704 = vpush %v603_v28 }
 0x2d4   :  { %v540_v29 = vpop.f32.mrb[8].mxu0 }
 0x2d5   :  { %v542_v30 = vpop.f32.mrb[9].mxu0  ;;  %v563_v23 = vmul.f32 %v540_v29, %v932_v61 }
 0x2d6   :  { %v564_v34 = vmul.f32 %v542_v30, %v936_v63 }
 0x2d8   :  { %v546_v31 = vpop.f32.mrb[10].mxu0 }
 0x2d9   :  { %v565_v32 = vmul.f32 %v546_v31, %v934_v62  ;;  %v548_v33 = vpop.f32.mrb[11].mxu0 }
 0x2da   :  { %v566_v35 = vmul.f32 %v548_v33, %v938_v0 }
 0x2db   :  { %v571_v36 = vadd.f32 %v565_v32, %v563_v23  ;;  %s705_s3 = spop %704 }
 0x2dc   :  { %v580_v37 = vadd.f32 %v566_v35, %v564_v34  ;;  %v552_v38 = vpop.f32.mrb[12].mxu0 }
 0x2dd   :  { %v567_v40 = vmul.f32 %v552_v38, %v944_v7  ;;  %v554_v41 = vpop.f32.mrb[13].mxu0  ;;  %v607_v7 = vstv %s705_s3 }
 0x2de   :  { %v568_v42 = vmul.f32 %v554_v41, %v946_v9  ;;  %v608_v57 = vmul.f32 %v607_v7, %v964_v39 }
 0x2df   :  { %v572_v43 = vadd.f32 %v571_v36, %v567_v40 }
 0x2e0   :  { %v581_v45 = vadd.f32 %v580_v37, %v568_v42  ;;  %v558_v47 = vpop.f32.mrb[16].mxu1  ;;  %v617_v2 = vrot.slane %v608_v57, %v972_v46 }
 0x2e1   :  { %v569_v61 = vmul.f32 %v558_v47, %v950_v15  ;;  %v560_v48 = vpop.f32.mrb[17].mxu1 }
 0x2e2   :  { %v570_v62 = vmul.f32 %v560_v48, %v952_v17  ;;  %v613_v17 = vrot.slane %v608_v57, %v970_v44 }
 0x2e3   :  { %v573_v49 = vadd.f32 %v572_v43, %v569_v61 }
 0x2e4   :  { %v582_v63 = vadd.f32 %v581_v45, %v570_v62 }
 0x2e5   :  { %v574_v50 = vrot.slane %v573_v49, 4 }
 0x2e6   :  { %v583_v0 = vrot.slane %v582_v63, 4 }
 0x2e7   :  { %v575_v51 = vadd.f32 %v574_v50, %v573_v49 }
 0x2e8   :  { %v584_v52 = vadd.f32 %v583_v0, %v582_v63 }
 0x2e9   :  { %v576_v54 = vrot.slane %v575_v51, 2 }
 0x2ea   :  { %v585_v55 = vrot.slane %v584_v52, 2 }
 0x2eb   :  { %v577_v27 = vadd.f32 %v576_v54, %v575_v51 }
 0x2ec   :  { %v586_v9 = vadd.f32 %v585_v55, %v584_v52 }
 0x2ed   :  { %v578_v58 = vrot.slane %v577_v27, 1 }
 0x2ee   :  { %v587_v59 = vrot.slane %v586_v9, 1 }
 0x2ef   :  { %v579_v15 = vadd.f32 %v578_v58, %v577_v27 }
 0x2f0   :  { %v588_v60 = vadd.f32 %v587_v59, %v586_v9 }
 0x2f1   :  { %v605_v1 = vadd.f32 %v579_v15, %v976_v53 }
 0x2f2   :  { %v606_v3 = vadd.f32 %v588_v60, %v981_v56 }
 0x2f3   :  { %v620_v4 = vadd.f32 %v613_v17, %v605_v1 }
 0x2f4   :  { %v621_v5 = vadd.f32 %v617_v2, %v606_v3 }
 0x2f6   :  { %v624_v6 = vcombine.low %v620_v4, %v621_v5 }
 0x2f8   :  { %v631_v8 = vrot.slane %v624_v6, %v989_v13 }
 0x2fa   :  { %v638_v39 = vrot.slane %v631_v8, %v989_v13 }
 0x2fc   :  { %641 = vst.msk [vmem:[#allocation8 + $0x1] ss:$2 sm:$0x3] %vm992_vm1, %v638_v39 }
 0x2fd   :  { %791 = shalt.err (!%p788_p0)
}
 0x2fe   :  { %s792_s12 = scalar_lea.hbm %s1033_s5, 64 }
 0x2ff   :  { %p793_p1 = scmp.ne.s32.totalorder %s1033_s5, %s792_s12  ;;  %p796_p2 = scmp.lt.u32.totalorder %s792_s12, %s1033_s5 }
 0x301   :  { %p798_p3 = pnand %p796_p2, %p793_p1 }
 0x303   :  { %801 = shalt.err (!%p798_p3)
}
 0x304   :  { %651 = dma.vmem_to_hbm [thread:$0]  %s649_s8, 64, %s1033_s5, [#allocation4]  }
 0x305   :  { %806 = dma.done.wait [#allocation4], 64  }
 0x306   :  { %807 = vsyncadd [#allocation4], 4294967232 }
 0x307   :  { %655 = vsyncpa [#allocation3], 1 }
 0x308   :  { %656 = vsyncpa [#allocation6], 1 }
 0x309   :  { %657 = vsyncpa [#allocation4], 1 }

</bundles_post_ra>
